<compile_context>
chip_gen: v6e
topology: v6e:2x2x1
jax: 0.10.0
libtpu: 0.0.40
codegen_flags: <defaults>
</compile_context>

<pallas_src>
import functools

import jax
import jax.numpy as jnp
from jax.experimental import pallas as pl
from jax.experimental.pallas import tpu as pltpu

K = 5                                  # matches PostprocessModel(k=5)
_LANE = 128
_SUBLANE = 8
_MAX_BN = 2048                         # classes streamed per grid step
_MAX_BM = 256                          # rows per grid step
_IN_PAIR_BUDGET = 8 * 1024 * 1024      # bytes for the double-buffered input tile


def _round_up(x, m):
    return ((x + m - 1) // m) * m


def _choose_tiles(batch, n_classes, itemsize):
    """Pick (bm, bn) so the double-buffered input tile sits comfortably inside
    every generation's scoped-VMEM budget (v5e 16 MiB / v6e 32 MiB / v7x 32 MiB
    default, 64 MiB physical) while keeping blocks big enough to amortize the
    ~0.35 us per-grid-step overhead."""
    bn = n_classes if n_classes <= _MAX_BN else _MAX_BN
    if batch <= _SUBLANE:
        return batch, bn               # full-extent row block (always legal)
    bm = _IN_PAIR_BUDGET // (2 * bn * itemsize)
    bm = (bm // _SUBLANE) * _SUBLANE
    bm = max(_SUBLANE, min(bm, _MAX_BM, (batch // _SUBLANE) * _SUBLANE))
    if batch >= 2 * _SUBLANE:
        # keep >= 2 row blocks so both v7x TensorCores get work and the
        # HBM<->VMEM pipeline has something to overlap
        bm = min(bm, _round_up(pl.cdiv(batch, 2), _SUBLANE))
    return bm, bn


def _topk_kernel(x_ref, out_ref, cand_v_ref, cand_i_ref, *, k, n_classes):
    """Streams one (bm, bn) logits block into per-lane top-k candidate stacks;
    on the last class block, reduces the candidate slab to the interleaved
    [idx, val] output columns."""
    jc = pl.program_id(1)
    bm, bn = x_ref.shape
    cw = cand_v_ref.shape[-1]          # candidate lane width (128, or bn)
    n_sub = bn // cw
    neg_inf = jnp.float32(-jnp.inf)
    sentinel = jnp.int32(jnp.iinfo(jnp.int32).max)

    # ---- init candidate stacks at the first class block (per row block) ----
    @pl.when(jc == 0)
    def _init():
        cand_v_ref[...] = jnp.full(cand_v_ref.shape, neg_inf, jnp.float32)
        cand_i_ref[...] = jnp.full(cand_i_ref.shape, sentinel, jnp.int32)

    # ---- VPU-only streaming insert into the per-lane candidate stacks ------
    lane = jax.lax.broadcasted_iota(jnp.int32, (bm, cw), 1)
    for s in range(n_sub):
        col = jc * bn + s * cw + lane                         # global class id
        valid = col < n_classes                               # mask padded tail
        xv = jnp.where(valid,
                       x_ref[:, s * cw:(s + 1) * cw].astype(jnp.float32),
                       neg_inf)
        xi = jnp.where(valid, col, sentinel)
        for t in range(k):                                    # k is tiny/static
            cv = cand_v_ref[t]
            ci = cand_i_ref[t]
            # lexicographic (value desc, index asc) => exact torch/lax ties
            take = (xv > cv) | ((xv == cv) & (xi < ci))
            cand_v_ref[t] = jnp.where(take, xv, cv)
            cand_i_ref[t] = jnp.where(take, xi, ci)
            xv = jnp.where(take, cv, xv)
            xi = jnp.where(take, ci, xi)

    # ---- final reduction over the small candidate slab ---------------------
    @pl.when(jc == pl.num_programs(1) - 1)
    def _finalize():
        cv = [cand_v_ref[t] for t in range(k)]
        ci = [cand_i_ref[t] for t in range(k)]
        for t in range(k):
            vmax = cv[0]
            for s in range(1, k):                             # fold k slabs (VPU)
                vmax = jnp.maximum(vmax, cv[s])
            m = jnp.max(vmax, axis=1, keepdims=True)          # (bm, 1)  XLU
            masked = jnp.where(cv[0] == m, ci[0], sentinel)
            for s in range(1, k):
                masked = jnp.minimum(masked, jnp.where(cv[s] == m, ci[s], sentinel))
            idx = jnp.min(masked, axis=1, keepdims=True)      # (bm, 1)  XLU
            # interleaved output columns: [idx_t, val_t]
            out_ref[:, 2 * t:2 * t + 1] = idx.astype(jnp.float32)
            out_ref[:, 2 * t + 1:2 * t + 2] = m
            # knock out the selected candidate (indices are unique)
            cv = [jnp.where(ci[s] == idx, neg_inf, cv[s]) for s in range(k)]


def postprocess(x, k=K, bm=None, bn=None):
    """x: (B, N) float  ->  (B, k, 2) float32 with [..., 0]=index, [..., 1]=value."""
    B, N = x.shape
    assert k <= N, "torch.topk requires k <= size along dim"
    auto_bm, auto_bn = _choose_tiles(B, N, x.dtype.itemsize)
    bm = auto_bm if bm is None else bm
    bn = auto_bn if bn is None else bn
    assert bm == B or bm % _SUBLANE == 0
    assert bn == N or bn % _LANE == 0
    cw = _LANE if bn % _LANE == 0 else bn
    grid = (pl.cdiv(B, bm), pl.cdiv(N, bn))

    vmem_bytes = (2 * bm * bn * x.dtype.itemsize     # double-buffered input block
                  + 2 * bm * 2 * k * 4               # double-buffered output block
                  + k * bm * cw * 8)                 # candidate values + indices
    vmem_limit = min(max(2 * vmem_bytes, 4 << 20) + (2 << 20), 64 << 20)

    out = pl.pallas_call(
        functools.partial(_topk_kernel, k=k, n_classes=N),
        out_shape=jax.ShapeDtypeStruct((B, 2 * k), jnp.float32),
        grid_spec=pltpu.PrefetchScalarGridSpec(
            num_scalar_prefetch=0,
            grid=grid,
            in_specs=[pl.BlockSpec((bm, bn), lambda i, j: (i, j))],
            out_specs=pl.BlockSpec((bm, 2 * k), lambda i, j: (i, 0)),
            scratch_shapes=[
                pltpu.VMEM((k, bm, cw), jnp.float32),   # candidate values
                pltpu.VMEM((k, bm, cw), jnp.int32),     # candidate indices
            ],
        ),
        compiler_params=pltpu.CompilerParams(
            dimension_semantics=("parallel", "arbitrary"),
            vmem_limit_bytes=int(vmem_limit),
        ),
        cost_estimate=pl.CostEstimate(
            flops=2 * k * B * N,
            transcendentals=0,
            bytes_accessed=B * N * x.dtype.itemsize + B * 2 * k * 4,
        ),
    )(x)

    # torch.stack([indices, values], dim=2): interleaved slab -> (B, k, 2)
    return out.reshape(B, k, 2)


def _reference(x, k):
    vals, idx = jax.lax.top_k(x, k)
    return jnp.stack([idx.astype(jnp.float32), vals.astype(jnp.float32)], axis=2)


if __name__ == "__main__":
    # Case 1: the basic shape (batch=8, classes=128).
    x = jax.random.normal(jax.random.PRNGKey(0), (8, 128), dtype=jnp.float32)
    out = jax.block_until_ready(postprocess(x))
    assert out.shape == (8, K, 2), out.shape
    assert jnp.allclose(out, _reference(x, K)), "mismatch (base case)"

    # Case 2: non-128-aligned class count + non-multiple-of-8 batch (masking path).
    x2 = jax.random.normal(jax.random.PRNGKey(1), (10, 300), dtype=jnp.float32)
    out2 = jax.block_until_ready(postprocess(x2))
    assert jnp.allclose(out2, _reference(x2, K)), "mismatch (ragged case)"

    # Case 3: multi row-block / multi class-block streaming path (forced small tiles).
    x3 = jax.random.normal(jax.random.PRNGKey(2), (16, 512), dtype=jnp.float32)
    out3 = jax.block_until_ready(postprocess(x3, bm=8, bn=256))
    assert jnp.allclose(out3, _reference(x3, K)), "mismatch (streaming case)"

    # Case 4: exact duplicates landing in the same candidate lane (tie order).
    half = jax.random.normal(jax.random.PRNGKey(3), (4, 128), dtype=jnp.float32)
    x4 = jnp.concatenate([half, half], axis=1)         # duplicates 128 cols apart
    out4 = jax.block_until_ready(postprocess(x4))
    assert jnp.allclose(out4, _reference(x4, K)), "mismatch (tie case)"

    print("KERNEL_OK")
</pallas_src>

<mosaic_0001>
module attributes {stable_mosaic.version = 11 : i64} {
  func.func @_topk_kernel(%arg0: i32, %arg1: i32, %arg2: memref<8x128xf32, #tpu.memory_space<vmem>>, %arg3: memref<8x10xf32, #tpu.memory_space<vmem>>, %arg4: memref<5x8x128xf32, #tpu.memory_space<vmem>>, %arg5: memref<5x8x128xi32, #tpu.memory_space<vmem>>) attributes {dimension_semantics = [#tpu.dimension_semantics<parallel>, #tpu.dimension_semantics<arbitrary>], iteration_bounds = array<i64: 1, 1>, scalar_prefetch = 0 : i64, scratch_operands = 2 : i64, tpu.core_type = #tpu.core_type<tc>, window_params = [{transform_indices = @transform_0, window_bounds = array<i64: 8, 128>}, {transform_indices = @transform_1, window_bounds = array<i64: 8, 10>}]} {
    %c0_i32 = arith.constant 0 : i32
    %0 = arith.cmpi eq, %arg1, %c0_i32 : i32
    %1 = arith.extui %0 : i1 to i32
    %cst = arith.constant 0xFF800000 : f32
    %c2147483647_i32 = arith.constant 2147483647 : i32
    %c0_i32_0 = arith.constant 0 : i32
    %2 = arith.cmpi ne, %1, %c0_i32_0 : i32
    scf.if %2 {
      %111 = vector.broadcast %cst : f32 to vector<5x8x128xf32>
      %c0_66 = arith.constant 0 : index
      %c0_67 = arith.constant 0 : index
      %c0_68 = arith.constant 0 : index
      %112 = vector.load %arg4[%c0_66, %c0_67, %c0_68] : memref<5x8x128xf32, #tpu.memory_space<vmem>>, vector<5x8x128xf32>
      tpu.vector_store %arg4[%c0_66, %c0_67, %c0_68], %111 {strides = array<i32>} : memref<5x8x128xf32, #tpu.memory_space<vmem>>, vector<5x8x128xf32>,
      %113 = vector.broadcast %c2147483647_i32 : i32 to vector<5x8x128xi32>
      %c0_69 = arith.constant 0 : index
      %c0_70 = arith.constant 0 : index
      %c0_71 = arith.constant 0 : index
      %114 = vector.load %arg5[%c0_69, %c0_70, %c0_71] : memref<5x8x128xi32, #tpu.memory_space<vmem>>, vector<5x8x128xi32>
      tpu.vector_store %arg5[%c0_69, %c0_70, %c0_71], %113 {strides = array<i32>} : memref<5x8x128xi32, #tpu.memory_space<vmem>>, vector<5x8x128xi32>,
    } else {
    }
    %3 = tpu.iota {dimensions = array<i32: 1>} : vector<8x128xi32>
    %c128_i32 = arith.constant 128 : i32
    %4 = arith.muli %arg1, %c128_i32 : i32
    %c0_i32_1 = arith.constant 0 : i32
    %5 = arith.addi %4, %c0_i32_1 : i32
    %6 = vector.broadcast %5 : i32 to vector<8x128xi32>
    %7 = arith.addi %6, %3 : vector<8x128xi32>
    %c128_i32_2 = arith.constant 128 : i32
    %8 = vector.broadcast %c128_i32_2 : i32 to vector<8x128xi32>
    %9 = arith.cmpi slt, %7, %8 : vector<8x128xi32>
    %c0 = arith.constant 0 : index
    %c0_3 = arith.constant 0 : index
    %10 = vector.load %arg2[%c0, %c0_3] : memref<8x128xf32, #tpu.memory_space<vmem>>, vector<8x128xf32>
    %cst_4 = arith.constant 0xFF800000 : f32
    %11 = vector.broadcast %cst_4 : f32 to vector<8x128xf32>
    %12 = arith.select %9, %10, %11 : vector<8x128xi1>, vector<8x128xf32>
    %c2147483647_i32_5 = arith.constant 2147483647 : i32
    %13 = vector.broadcast %c2147483647_i32_5 : i32 to vector<8x128xi32>
    %14 = arith.select %9, %7, %13 : vector<8x128xi1>, vector<8x128xi32>
    %c0_6 = arith.constant 0 : index
    %c0_7 = arith.constant 0 : index
    %c0_8 = arith.constant 0 : index
    %15 = vector.load %arg4[%c0_6, %c0_7, %c0_8] : memref<5x8x128xf32, #tpu.memory_space<vmem>>, vector<1x8x128xf32>
    %16 = vector.shape_cast %15 : vector<1x8x128xf32> to vector<8x128xf32>
    %c0_9 = arith.constant 0 : index
    %c0_10 = arith.constant 0 : index
    %c0_11 = arith.constant 0 : index
    %17 = vector.load %arg5[%c0_9, %c0_10, %c0_11] : memref<5x8x128xi32, #tpu.memory_space<vmem>>, vector<1x8x128xi32>
    %18 = vector.shape_cast %17 : vector<1x8x128xi32> to vector<8x128xi32>
    %19 = arith.cmpf ogt, %12, %16 : vector<8x128xf32>
    %20 = arith.cmpf oeq, %12, %16 : vector<8x128xf32>
    %21 = arith.cmpi slt, %14, %18 : vector<8x128xi32>
    %22 = arith.andi %20, %21 : vector<8x128xi1>
    %23 = arith.ori %19, %22 : vector<8x128xi1>
    %24 = arith.select %23, %12, %16 : vector<8x128xi1>, vector<8x128xf32>
    %c0_12 = arith.constant 0 : index
    %c0_13 = arith.constant 0 : index
    %c0_14 = arith.constant 0 : index
    %25 = vector.load %arg4[%c0_12, %c0_13, %c0_14] : memref<5x8x128xf32, #tpu.memory_space<vmem>>, vector<1x8x128xf32>
    %26 = vector.shape_cast %25 : vector<1x8x128xf32> to vector<8x128xf32>
    %27 = vector.shape_cast %24 : vector<8x128xf32> to vector<1x8x128xf32>
    tpu.vector_store %arg4[%c0_12, %c0_13, %c0_14], %27 {strides = array<i32>} : memref<5x8x128xf32, #tpu.memory_space<vmem>>, vector<1x8x128xf32>,
    %28 = arith.select %23, %14, %18 : vector<8x128xi1>, vector<8x128xi32>
    %c0_15 = arith.constant 0 : index
    %c0_16 = arith.constant 0 : index
    %c0_17 = arith.constant 0 : index
    %29 = vector.load %arg5[%c0_15, %c0_16, %c0_17] : memref<5x8x128xi32, #tpu.memory_space<vmem>>, vector<1x8x128xi32>
    %30 = vector.shape_cast %29 : vector<1x8x128xi32> to vector<8x128xi32>
    %31 = vector.shape_cast %28 : vector<8x128xi32> to vector<1x8x128xi32>
    tpu.vector_store %arg5[%c0_15, %c0_16, %c0_17], %31 {strides = array<i32>} : memref<5x8x128xi32, #tpu.memory_space<vmem>>, vector<1x8x128xi32>,
    %32 = arith.select %23, %16, %12 : vector<8x128xi1>, vector<8x128xf32>
    %33 = arith.select %23, %18, %14 : vector<8x128xi1>, vector<8x128xi32>
    %c1 = arith.constant 1 : index
    %c0_18 = arith.constant 0 : index
    %c0_19 = arith.constant 0 : index
    %34 = vector.load %arg4[%c1, %c0_18, %c0_19] : memref<5x8x128xf32, #tpu.memory_space<vmem>>, vector<1x8x128xf32>
    %35 = vector.shape_cast %34 : vector<1x8x128xf32> to vector<8x128xf32>
    %c1_20 = arith.constant 1 : index
    %c0_21 = arith.constant 0 : index
    %c0_22 = arith.constant 0 : index
    %36 = vector.load %arg5[%c1_20, %c0_21, %c0_22] : memref<5x8x128xi32, #tpu.memory_space<vmem>>, vector<1x8x128xi32>
    %37 = vector.shape_cast %36 : vector<1x8x128xi32> to vector<8x128xi32>
    %38 = arith.cmpf ogt, %32, %35 : vector<8x128xf32>
    %39 = arith.cmpf oeq, %32, %35 : vector<8x128xf32>
    %40 = arith.cmpi slt, %33, %37 : vector<8x128xi32>
    %41 = arith.andi %39, %40 : vector<8x128xi1>
    %42 = arith.ori %38, %41 : vector<8x128xi1>
    %43 = arith.select %42, %32, %35 : vector<8x128xi1>, vector<8x128xf32>
    %c1_23 = arith.constant 1 : index
    %c0_24 = arith.constant 0 : index
    %c0_25 = arith.constant 0 : index
    %44 = vector.load %arg4[%c1_23, %c0_24, %c0_25] : memref<5x8x128xf32, #tpu.memory_space<vmem>>, vector<1x8x128xf32>
    %45 = vector.shape_cast %44 : vector<1x8x128xf32> to vector<8x128xf32>
    %46 = vector.shape_cast %43 : vector<8x128xf32> to vector<1x8x128xf32>
    tpu.vector_store %arg4[%c1_23, %c0_24, %c0_25], %46 {strides = array<i32>} : memref<5x8x128xf32, #tpu.memory_space<vmem>>, vector<1x8x128xf32>,
    %47 = arith.select %42, %33, %37 : vector<8x128xi1>, vector<8x128xi32>
    %c1_26 = arith.constant 1 : index
    %c0_27 = arith.constant 0 : index
    %c0_28 = arith.constant 0 : index
    %48 = vector.load %arg5[%c1_26, %c0_27, %c0_28] : memref<5x8x128xi32, #tpu.memory_space<vmem>>, vector<1x8x128xi32>
    %49 = vector.shape_cast %48 : vector<1x8x128xi32> to vector<8x128xi32>
    %50 = vector.shape_cast %47 : vector<8x128xi32> to vector<1x8x128xi32>
    tpu.vector_store %arg5[%c1_26, %c0_27, %c0_28], %50 {strides = array<i32>} : memref<5x8x128xi32, #tpu.memory_space<vmem>>, vector<1x8x128xi32>,
    %51 = arith.select %42, %35, %32 : vector<8x128xi1>, vector<8x128xf32>
    %52 = arith.select %42, %37, %33 : vector<8x128xi1>, vector<8x128xi32>
    %c2 = arith.constant 2 : index
    %c0_29 = arith.constant 0 : index
    %c0_30 = arith.constant 0 : index
    %53 = vector.load %arg4[%c2, %c0_29, %c0_30] : memref<5x8x128xf32, #tpu.memory_space<vmem>>, vector<1x8x128xf32>
    %54 = vector.shape_cast %53 : vector<1x8x128xf32> to vector<8x128xf32>
    %c2_31 = arith.constant 2 : index
    %c0_32 = arith.constant 0 : index
    %c0_33 = arith.constant 0 : index
    %55 = vector.load %arg5[%c2_31, %c0_32, %c0_33] : memref<5x8x128xi32, #tpu.memory_space<vmem>>, vector<1x8x128xi32>
    %56 = vector.shape_cast %55 : vector<1x8x128xi32> to vector<8x128xi32>
    %57 = arith.cmpf ogt, %51, %54 : vector<8x128xf32>
    %58 = arith.cmpf oeq, %51, %54 : vector<8x128xf32>
    %59 = arith.cmpi slt, %52, %56 : vector<8x128xi32>
    %60 = arith.andi %58, %59 : vector<8x128xi1>
    %61 = arith.ori %57, %60 : vector<8x128xi1>
    %62 = arith.select %61, %51, %54 : vector<8x128xi1>, vector<8x128xf32>
    %c2_34 = arith.constant 2 : index
    %c0_35 = arith.constant 0 : index
    %c0_36 = arith.constant 0 : index
    %63 = vector.load %arg4[%c2_34, %c0_35, %c0_36] : memref<5x8x128xf32, #tpu.memory_space<vmem>>, vector<1x8x128xf32>
    %64 = vector.shape_cast %63 : vector<1x8x128xf32> to vector<8x128xf32>
    %65 = vector.shape_cast %62 : vector<8x128xf32> to vector<1x8x128xf32>
    tpu.vector_store %arg4[%c2_34, %c0_35, %c0_36], %65 {strides = array<i32>} : memref<5x8x128xf32, #tpu.memory_space<vmem>>, vector<1x8x128xf32>,
    %66 = arith.select %61, %52, %56 : vector<8x128xi1>, vector<8x128xi32>
    %c2_37 = arith.constant 2 : index
    %c0_38 = arith.constant 0 : index
    %c0_39 = arith.constant 0 : index
    %67 = vector.load %arg5[%c2_37, %c0_38, %c0_39] : memref<5x8x128xi32, #tpu.memory_space<vmem>>, vector<1x8x128xi32>
    %68 = vector.shape_cast %67 : vector<1x8x128xi32> to vector<8x128xi32>
    %69 = vector.shape_cast %66 : vector<8x128xi32> to vector<1x8x128xi32>
    tpu.vector_store %arg5[%c2_37, %c0_38, %c0_39], %69 {strides = array<i32>} : memref<5x8x128xi32, #tpu.memory_space<vmem>>, vector<1x8x128xi32>,
    %70 = arith.select %61, %54, %51 : vector<8x128xi1>, vector<8x128xf32>
    %71 = arith.select %61, %56, %52 : vector<8x128xi1>, vector<8x128xi32>
    %c3 = arith.constant 3 : index
    %c0_40 = arith.constant 0 : index
    %c0_41 = arith.constant 0 : index
    %72 = vector.load %arg4[%c3, %c0_40, %c0_41] : memref<5x8x128xf32, #tpu.memory_space<vmem>>, vector<1x8x128xf32>
    %73 = vector.shape_cast %72 : vector<1x8x128xf32> to vector<8x128xf32>
    %c3_42 = arith.constant 3 : index
    %c0_43 = arith.constant 0 : index
    %c0_44 = arith.constant 0 : index
    %74 = vector.load %arg5[%c3_42, %c0_43, %c0_44] : memref<5x8x128xi32, #tpu.memory_space<vmem>>, vector<1x8x128xi32>
    %75 = vector.shape_cast %74 : vector<1x8x128xi32> to vector<8x128xi32>
    %76 = arith.cmpf ogt, %70, %73 : vector<8x128xf32>
    %77 = arith.cmpf oeq, %70, %73 : vector<8x128xf32>
    %78 = arith.cmpi slt, %71, %75 : vector<8x128xi32>
    %79 = arith.andi %77, %78 : vector<8x128xi1>
    %80 = arith.ori %76, %79 : vector<8x128xi1>
    %81 = arith.select %80, %70, %73 : vector<8x128xi1>, vector<8x128xf32>
    %c3_45 = arith.constant 3 : index
    %c0_46 = arith.constant 0 : index
    %c0_47 = arith.constant 0 : index
    %82 = vector.load %arg4[%c3_45, %c0_46, %c0_47] : memref<5x8x128xf32, #tpu.memory_space<vmem>>, vector<1x8x128xf32>
    %83 = vector.shape_cast %82 : vector<1x8x128xf32> to vector<8x128xf32>
    %84 = vector.shape_cast %81 : vector<8x128xf32> to vector<1x8x128xf32>
    tpu.vector_store %arg4[%c3_45, %c0_46, %c0_47], %84 {strides = array<i32>} : memref<5x8x128xf32, #tpu.memory_space<vmem>>, vector<1x8x128xf32>,
    %85 = arith.select %80, %71, %75 : vector<8x128xi1>, vector<8x128xi32>
    %c3_48 = arith.constant 3 : index
    %c0_49 = arith.constant 0 : index
    %c0_50 = arith.constant 0 : index
    %86 = vector.load %arg5[%c3_48, %c0_49, %c0_50] : memref<5x8x128xi32, #tpu.memory_space<vmem>>, vector<1x8x128xi32>
    %87 = vector.shape_cast %86 : vector<1x8x128xi32> to vector<8x128xi32>
    %88 = vector.shape_cast %85 : vector<8x128xi32> to vector<1x8x128xi32>
    tpu.vector_store %arg5[%c3_48, %c0_49, %c0_50], %88 {strides = array<i32>} : memref<5x8x128xi32, #tpu.memory_space<vmem>>, vector<1x8x128xi32>,
    %89 = arith.select %80, %73, %70 : vector<8x128xi1>, vector<8x128xf32>
    %90 = arith.select %80, %75, %71 : vector<8x128xi1>, vector<8x128xi32>
    %c4 = arith.constant 4 : index
    %c0_51 = arith.constant 0 : index
    %c0_52 = arith.constant 0 : index
    %91 = vector.load %arg4[%c4, %c0_51, %c0_52] : memref<5x8x128xf32, #tpu.memory_space<vmem>>, vector<1x8x128xf32>
    %92 = vector.shape_cast %91 : vector<1x8x128xf32> to vector<8x128xf32>
    %c4_53 = arith.constant 4 : index
    %c0_54 = arith.constant 0 : index
    %c0_55 = arith.constant 0 : index
    %93 = vector.load %arg5[%c4_53, %c0_54, %c0_55] : memref<5x8x128xi32, #tpu.memory_space<vmem>>, vector<1x8x128xi32>
    %94 = vector.shape_cast %93 : vector<1x8x128xi32> to vector<8x128xi32>
    %95 = arith.cmpf ogt, %89, %92 : vector<8x128xf32>
    %96 = arith.cmpf oeq, %89, %92 : vector<8x128xf32>
    %97 = arith.cmpi slt, %90, %94 : vector<8x128xi32>
    %98 = arith.andi %96, %97 : vector<8x128xi1>
    %99 = arith.ori %95, %98 : vector<8x128xi1>
    %100 = arith.select %99, %89, %92 : vector<8x128xi1>, vector<8x128xf32>
    %c4_56 = arith.constant 4 : index
    %c0_57 = arith.constant 0 : index
    %c0_58 = arith.constant 0 : index
    %101 = vector.load %arg4[%c4_56, %c0_57, %c0_58] : memref<5x8x128xf32, #tpu.memory_space<vmem>>, vector<1x8x128xf32>
    %102 = vector.shape_cast %101 : vector<1x8x128xf32> to vector<8x128xf32>
    %103 = vector.shape_cast %100 : vector<8x128xf32> to vector<1x8x128xf32>
    tpu.vector_store %arg4[%c4_56, %c0_57, %c0_58], %103 {strides = array<i32>} : memref<5x8x128xf32, #tpu.memory_space<vmem>>, vector<1x8x128xf32>,
    %104 = arith.select %99, %90, %94 : vector<8x128xi1>, vector<8x128xi32>
    %c4_59 = arith.constant 4 : index
    %c0_60 = arith.constant 0 : index
    %c0_61 = arith.constant 0 : index
    %105 = vector.load %arg5[%c4_59, %c0_60, %c0_61] : memref<5x8x128xi32, #tpu.memory_space<vmem>>, vector<1x8x128xi32>
    %106 = vector.shape_cast %105 : vector<1x8x128xi32> to vector<8x128xi32>
    %107 = vector.shape_cast %104 : vector<8x128xi32> to vector<1x8x128xi32>
    tpu.vector_store %arg5[%c4_59, %c0_60, %c0_61], %107 {strides = array<i32>} : memref<5x8x128xi32, #tpu.memory_space<vmem>>, vector<1x8x128xi32>,
    %c0_i32_62 = arith.constant 0 : i32
    %108 = arith.cmpi eq, %arg1, %c0_i32_62 : i32
    %109 = arith.extui %108 : i1 to i32
    %c2147483647_i32_63 = arith.constant 2147483647 : i32
    %cst_64 = arith.constant 0xFF800000 : f32
    %c0_i32_65 = arith.constant 0 : i32
    %110 = arith.cmpi ne, %109, %c0_i32_65 : i32
    scf.if %110 {
      %c0_66 = arith.constant 0 : index
      %c0_67 = arith.constant 0 : index
      %c0_68 = arith.constant 0 : index
      %111 = vector.load %arg4[%c0_66, %c0_67, %c0_68] : memref<5x8x128xf32, #tpu.memory_space<vmem>>, vector<1x8x128xf32>
      %112 = vector.shape_cast %111 : vector<1x8x128xf32> to vector<8x128xf32>
      %c1_69 = arith.constant 1 : index
      %c0_70 = arith.constant 0 : index
      %c0_71 = arith.constant 0 : index
      %113 = vector.load %arg4[%c1_69, %c0_70, %c0_71] : memref<5x8x128xf32, #tpu.memory_space<vmem>>, vector<1x8x128xf32>
      %114 = vector.shape_cast %113 : vector<1x8x128xf32> to vector<8x128xf32>
      %c2_72 = arith.constant 2 : index
      %c0_73 = arith.constant 0 : index
      %c0_74 = arith.constant 0 : index
      %115 = vector.load %arg4[%c2_72, %c0_73, %c0_74] : memref<5x8x128xf32, #tpu.memory_space<vmem>>, vector<1x8x128xf32>
      %116 = vector.shape_cast %115 : vector<1x8x128xf32> to vector<8x128xf32>
      %c3_75 = arith.constant 3 : index
      %c0_76 = arith.constant 0 : index
      %c0_77 = arith.constant 0 : index
      %117 = vector.load %arg4[%c3_75, %c0_76, %c0_77] : memref<5x8x128xf32, #tpu.memory_space<vmem>>, vector<1x8x128xf32>
      %118 = vector.shape_cast %117 : vector<1x8x128xf32> to vector<8x128xf32>
      %c4_78 = arith.constant 4 : index
      %c0_79 = arith.constant 0 : index
      %c0_80 = arith.constant 0 : index
      %119 = vector.load %arg4[%c4_78, %c0_79, %c0_80] : memref<5x8x128xf32, #tpu.memory_space<vmem>>, vector<1x8x128xf32>
      %120 = vector.shape_cast %119 : vector<1x8x128xf32> to vector<8x128xf32>
      %c0_81 = arith.constant 0 : index
      %c0_82 = arith.constant 0 : index
      %c0_83 = arith.constant 0 : index
      %121 = vector.load %arg5[%c0_81, %c0_82, %c0_83] : memref<5x8x128xi32, #tpu.memory_space<vmem>>, vector<1x8x128xi32>
      %122 = vector.shape_cast %121 : vector<1x8x128xi32> to vector<8x128xi32>
      %c1_84 = arith.constant 1 : index
      %c0_85 = arith.constant 0 : index
      %c0_86 = arith.constant 0 : index
      %123 = vector.load %arg5[%c1_84, %c0_85, %c0_86] : memref<5x8x128xi32, #tpu.memory_space<vmem>>, vector<1x8x128xi32>
      %124 = vector.shape_cast %123 : vector<1x8x128xi32> to vector<8x128xi32>
      %c2_87 = arith.constant 2 : index
      %c0_88 = arith.constant 0 : index
      %c0_89 = arith.constant 0 : index
      %125 = vector.load %arg5[%c2_87, %c0_88, %c0_89] : memref<5x8x128xi32, #tpu.memory_space<vmem>>, vector<1x8x128xi32>
      %126 = vector.shape_cast %125 : vector<1x8x128xi32> to vector<8x128xi32>
      %c3_90 = arith.constant 3 : index
      %c0_91 = arith.constant 0 : index
      %c0_92 = arith.constant 0 : index
      %127 = vector.load %arg5[%c3_90, %c0_91, %c0_92] : memref<5x8x128xi32, #tpu.memory_space<vmem>>, vector<1x8x128xi32>
      %128 = vector.shape_cast %127 : vector<1x8x128xi32> to vector<8x128xi32>
      %c4_93 = arith.constant 4 : index
      %c0_94 = arith.constant 0 : index
      %c0_95 = arith.constant 0 : index
      %129 = vector.load %arg5[%c4_93, %c0_94, %c0_95] : memref<5x8x128xi32, #tpu.memory_space<vmem>>, vector<1x8x128xi32>
      %130 = vector.shape_cast %129 : vector<1x8x128xi32> to vector<8x128xi32>
      %131 = arith.maximumf %112, %114 : vector<8x128xf32>
      %132 = arith.maximumf %131, %116 : vector<8x128xf32>
      %133 = arith.maximumf %132, %118 : vector<8x128xf32>
      %134 = arith.maximumf %133, %120 : vector<8x128xf32>
      %cst_96 = arith.constant dense<0xFF800000> : vector<8xf32>
      %135 = vector.multi_reduction <maximumf>, %134, %cst_96 [1] : vector<8x128xf32> to vector<8xf32>
      %136 = vector.shape_cast %135 : vector<8xf32> to vector<8x1xf32>
      %137 = vector.broadcast %136 : vector<8x1xf32> to vector<8x128xf32>
      %138 = arith.cmpf oeq, %112, %137 : vector<8x128xf32>
      %139 = vector.broadcast %c2147483647_i32_63 : i32 to vector<8x128xi32>
      %140 = arith.select %138, %122, %139 : vector<8x128xi1>, vector<8x128xi32>
      %141 = vector.broadcast %136 : vector<8x1xf32> to vector<8x128xf32>
      %142 = arith.cmpf oeq, %114, %141 : vector<8x128xf32>
      %143 = vector.broadcast %c2147483647_i32_63 : i32 to vector<8x128xi32>
      %144 = arith.select %142, %124, %143 : vector<8x128xi1>, vector<8x128xi32>
      %145 = arith.minsi %140, %144 : vector<8x128xi32>
      %146 = vector.broadcast %136 : vector<8x1xf32> to vector<8x128xf32>
      %147 = arith.cmpf oeq, %116, %146 : vector<8x128xf32>
      %148 = vector.broadcast %c2147483647_i32_63 : i32 to vector<8x128xi32>
      %149 = arith.select %147, %126, %148 : vector<8x128xi1>, vector<8x128xi32>
      %150 = arith.minsi %145, %149 : vector<8x128xi32>
      %151 = vector.broadcast %136 : vector<8x1xf32> to vector<8x128xf32>
      %152 = arith.cmpf oeq, %118, %151 : vector<8x128xf32>
      %153 = vector.broadcast %c2147483647_i32_63 : i32 to vector<8x128xi32>
      %154 = arith.select %152, %128, %153 : vector<8x128xi1>, vector<8x128xi32>
      %155 = arith.minsi %150, %154 : vector<8x128xi32>
      %156 = vector.broadcast %136 : vector<8x1xf32> to vector<8x128xf32>
      %157 = arith.cmpf oeq, %120, %156 : vector<8x128xf32>
      %158 = vector.broadcast %c2147483647_i32_63 : i32 to vector<8x128xi32>
      %159 = arith.select %157, %130, %158 : vector<8x128xi1>, vector<8x128xi32>
      %160 = arith.minsi %155, %159 : vector<8x128xi32>
      %cst_97 = arith.constant dense<2147483647> : vector<8xi32>
      %161 = vector.multi_reduction <minsi>, %160, %cst_97 [1] : vector<8x128xi32> to vector<8xi32>
      %162 = vector.shape_cast %161 : vector<8xi32> to vector<8x1xi32>
      %163 = arith.sitofp %162 : vector<8x1xi32> to vector<8x1xf32>
      %c0_98 = arith.constant 0 : index
      %c0_99 = arith.constant 0 : index
      %164 = vector.load %arg3[%c0_98, %c0_99] : memref<8x10xf32, #tpu.memory_space<vmem>>, vector<8x1xf32>
      tpu.vector_store %arg3[%c0_98, %c0_99], %163 {strides = array<i32>} : memref<8x10xf32, #tpu.memory_space<vmem>>, vector<8x1xf32>,
      %c0_100 = arith.constant 0 : index
      %c1_101 = arith.constant 1 : index
      %165 = vector.load %arg3[%c0_100, %c1_101] : memref<8x10xf32, #tpu.memory_space<vmem>>, vector<8x1xf32>
      tpu.vector_store %arg3[%c0_100, %c1_101], %136 {strides = array<i32>} : memref<8x10xf32, #tpu.memory_space<vmem>>, vector<8x1xf32>,
      %166 = vector.broadcast %162 : vector<8x1xi32> to vector<8x128xi32>
      %167 = arith.cmpi eq, %122, %166 : vector<8x128xi32>
      %168 = vector.broadcast %cst_64 : f32 to vector<8x128xf32>
      %169 = arith.select %167, %168, %112 : vector<8x128xi1>, vector<8x128xf32>
      %170 = vector.broadcast %162 : vector<8x1xi32> to vector<8x128xi32>
      %171 = arith.cmpi eq, %124, %170 : vector<8x128xi32>
      %172 = vector.broadcast %cst_64 : f32 to vector<8x128xf32>
      %173 = arith.select %171, %172, %114 : vector<8x128xi1>, vector<8x128xf32>
      %174 = vector.broadcast %162 : vector<8x1xi32> to vector<8x128xi32>
      %175 = arith.cmpi eq, %126, %174 : vector<8x128xi32>
      %176 = vector.broadcast %cst_64 : f32 to vector<8x128xf32>
      %177 = arith.select %175, %176, %116 : vector<8x128xi1>, vector<8x128xf32>
      %178 = vector.broadcast %162 : vector<8x1xi32> to vector<8x128xi32>
      %179 = arith.cmpi eq, %128, %178 : vector<8x128xi32>
      %180 = vector.broadcast %cst_64 : f32 to vector<8x128xf32>
      %181 = arith.select %179, %180, %118 : vector<8x128xi1>, vector<8x128xf32>
      %182 = vector.broadcast %162 : vector<8x1xi32> to vector<8x128xi32>
      %183 = arith.cmpi eq, %130, %182 : vector<8x128xi32>
      %184 = vector.broadcast %cst_64 : f32 to vector<8x128xf32>
      %185 = arith.select %183, %184, %120 : vector<8x128xi1>, vector<8x128xf32>
      %186 = arith.maximumf %169, %173 : vector<8x128xf32>
      %187 = arith.maximumf %186, %177 : vector<8x128xf32>
      %188 = arith.maximumf %187, %181 : vector<8x128xf32>
      %189 = arith.maximumf %188, %185 : vector<8x128xf32>
      %cst_102 = arith.constant dense<0xFF800000> : vector<8xf32>
      %190 = vector.multi_reduction <maximumf>, %189, %cst_102 [1] : vector<8x128xf32> to vector<8xf32>
      %191 = vector.shape_cast %190 : vector<8xf32> to vector<8x1xf32>
      %192 = vector.broadcast %191 : vector<8x1xf32> to vector<8x128xf32>
      %193 = arith.cmpf oeq, %169, %192 : vector<8x128xf32>
      %194 = vector.broadcast %c2147483647_i32_63 : i32 to vector<8x128xi32>
      %195 = arith.select %193, %122, %194 : vector<8x128xi1>, vector<8x128xi32>
      %196 = vector.broadcast %191 : vector<8x1xf32> to vector<8x128xf32>
      %197 = arith.cmpf oeq, %173, %196 : vector<8x128xf32>
      %198 = vector.broadcast %c2147483647_i32_63 : i32 to vector<8x128xi32>
      %199 = arith.select %197, %124, %198 : vector<8x128xi1>, vector<8x128xi32>
      %200 = arith.minsi %195, %199 : vector<8x128xi32>
      %201 = vector.broadcast %191 : vector<8x1xf32> to vector<8x128xf32>
      %202 = arith.cmpf oeq, %177, %201 : vector<8x128xf32>
      %203 = vector.broadcast %c2147483647_i32_63 : i32 to vector<8x128xi32>
      %204 = arith.select %202, %126, %203 : vector<8x128xi1>, vector<8x128xi32>
      %205 = arith.minsi %200, %204 : vector<8x128xi32>
      %206 = vector.broadcast %191 : vector<8x1xf32> to vector<8x128xf32>
      %207 = arith.cmpf oeq, %181, %206 : vector<8x128xf32>
      %208 = vector.broadcast %c2147483647_i32_63 : i32 to vector<8x128xi32>
      %209 = arith.select %207, %128, %208 : vector<8x128xi1>, vector<8x128xi32>
      %210 = arith.minsi %205, %209 : vector<8x128xi32>
      %211 = vector.broadcast %191 : vector<8x1xf32> to vector<8x128xf32>
      %212 = arith.cmpf oeq, %185, %211 : vector<8x128xf32>
      %213 = vector.broadcast %c2147483647_i32_63 : i32 to vector<8x128xi32>
      %214 = arith.select %212, %130, %213 : vector<8x128xi1>, vector<8x128xi32>
      %215 = arith.minsi %210, %214 : vector<8x128xi32>
      %cst_103 = arith.constant dense<2147483647> : vector<8xi32>
      %216 = vector.multi_reduction <minsi>, %215, %cst_103 [1] : vector<8x128xi32> to vector<8xi32>
      %217 = vector.shape_cast %216 : vector<8xi32> to vector<8x1xi32>
      %218 = arith.sitofp %217 : vector<8x1xi32> to vector<8x1xf32>
      %c0_104 = arith.constant 0 : index
      %c2_105 = arith.constant 2 : index
      %219 = vector.load %arg3[%c0_104, %c2_105] : memref<8x10xf32, #tpu.memory_space<vmem>>, vector<8x1xf32>
      tpu.vector_store %arg3[%c0_104, %c2_105], %218 {strides = array<i32>} : memref<8x10xf32, #tpu.memory_space<vmem>>, vector<8x1xf32>,
      %c0_106 = arith.constant 0 : index
      %c3_107 = arith.constant 3 : index
      %220 = vector.load %arg3[%c0_106, %c3_107] : memref<8x10xf32, #tpu.memory_space<vmem>>, vector<8x1xf32>
      tpu.vector_store %arg3[%c0_106, %c3_107], %191 {strides = array<i32>} : memref<8x10xf32, #tpu.memory_space<vmem>>, vector<8x1xf32>,
      %221 = vector.broadcast %217 : vector<8x1xi32> to vector<8x128xi32>
      %222 = arith.cmpi eq, %122, %221 : vector<8x128xi32>
      %223 = vector.broadcast %cst_64 : f32 to vector<8x128xf32>
      %224 = arith.select %222, %223, %169 : vector<8x128xi1>, vector<8x128xf32>
      %225 = vector.broadcast %217 : vector<8x1xi32> to vector<8x128xi32>
      %226 = arith.cmpi eq, %124, %225 : vector<8x128xi32>
      %227 = vector.broadcast %cst_64 : f32 to vector<8x128xf32>
      %228 = arith.select %226, %227, %173 : vector<8x128xi1>, vector<8x128xf32>
      %229 = vector.broadcast %217 : vector<8x1xi32> to vector<8x128xi32>
      %230 = arith.cmpi eq, %126, %229 : vector<8x128xi32>
      %231 = vector.broadcast %cst_64 : f32 to vector<8x128xf32>
      %232 = arith.select %230, %231, %177 : vector<8x128xi1>, vector<8x128xf32>
      %233 = vector.broadcast %217 : vector<8x1xi32> to vector<8x128xi32>
      %234 = arith.cmpi eq, %128, %233 : vector<8x128xi32>
      %235 = vector.broadcast %cst_64 : f32 to vector<8x128xf32>
      %236 = arith.select %234, %235, %181 : vector<8x128xi1>, vector<8x128xf32>
      %237 = vector.broadcast %217 : vector<8x1xi32> to vector<8x128xi32>
      %238 = arith.cmpi eq, %130, %237 : vector<8x128xi32>
      %239 = vector.broadcast %cst_64 : f32 to vector<8x128xf32>
      %240 = arith.select %238, %239, %185 : vector<8x128xi1>, vector<8x128xf32>
      %241 = arith.maximumf %224, %228 : vector<8x128xf32>
      %242 = arith.maximumf %241, %232 : vector<8x128xf32>
      %243 = arith.maximumf %242, %236 : vector<8x128xf32>
      %244 = arith.maximumf %243, %240 : vector<8x128xf32>
      %cst_108 = arith.constant dense<0xFF800000> : vector<8xf32>
      %245 = vector.multi_reduction <maximumf>, %244, %cst_108 [1] : vector<8x128xf32> to vector<8xf32>
      %246 = vector.shape_cast %245 : vector<8xf32> to vector<8x1xf32>
      %247 = vector.broadcast %246 : vector<8x1xf32> to vector<8x128xf32>
      %248 = arith.cmpf oeq, %224, %247 : vector<8x128xf32>
      %249 = vector.broadcast %c2147483647_i32_63 : i32 to vector<8x128xi32>
      %250 = arith.select %248, %122, %249 : vector<8x128xi1>, vector<8x128xi32>
      %251 = vector.broadcast %246 : vector<8x1xf32> to vector<8x128xf32>
      %252 = arith.cmpf oeq, %228, %251 : vector<8x128xf32>
      %253 = vector.broadcast %c2147483647_i32_63 : i32 to vector<8x128xi32>
      %254 = arith.select %252, %124, %253 : vector<8x128xi1>, vector<8x128xi32>
      %255 = arith.minsi %250, %254 : vector<8x128xi32>
      %256 = vector.broadcast %246 : vector<8x1xf32> to vector<8x128xf32>
      %257 = arith.cmpf oeq, %232, %256 : vector<8x128xf32>
      %258 = vector.broadcast %c2147483647_i32_63 : i32 to vector<8x128xi32>
      %259 = arith.select %257, %126, %258 : vector<8x128xi1>, vector<8x128xi32>
      %260 = arith.minsi %255, %259 : vector<8x128xi32>
      %261 = vector.broadcast %246 : vector<8x1xf32> to vector<8x128xf32>
      %262 = arith.cmpf oeq, %236, %261 : vector<8x128xf32>
      %263 = vector.broadcast %c2147483647_i32_63 : i32 to vector<8x128xi32>
      %264 = arith.select %262, %128, %263 : vector<8x128xi1>, vector<8x128xi32>
      %265 = arith.minsi %260, %264 : vector<8x128xi32>
      %266 = vector.broadcast %246 : vector<8x1xf32> to vector<8x128xf32>
      %267 = arith.cmpf oeq, %240, %266 : vector<8x128xf32>
      %268 = vector.broadcast %c2147483647_i32_63 : i32 to vector<8x128xi32>
      %269 = arith.select %267, %130, %268 : vector<8x128xi1>, vector<8x128xi32>
      %270 = arith.minsi %265, %269 : vector<8x128xi32>
      %cst_109 = arith.constant dense<2147483647> : vector<8xi32>
      %271 = vector.multi_reduction <minsi>, %270, %cst_109 [1] : vector<8x128xi32> to vector<8xi32>
      %272 = vector.shape_cast %271 : vector<8xi32> to vector<8x1xi32>
      %273 = arith.sitofp %272 : vector<8x1xi32> to vector<8x1xf32>
      %c0_110 = arith.constant 0 : index
      %c4_111 = arith.constant 4 : index
      %274 = vector.load %arg3[%c0_110, %c4_111] : memref<8x10xf32, #tpu.memory_space<vmem>>, vector<8x1xf32>
      tpu.vector_store %arg3[%c0_110, %c4_111], %273 {strides = array<i32>} : memref<8x10xf32, #tpu.memory_space<vmem>>, vector<8x1xf32>,
      %c0_112 = arith.constant 0 : index
      %c5 = arith.constant 5 : index
      %275 = vector.load %arg3[%c0_112, %c5] : memref<8x10xf32, #tpu.memory_space<vmem>>, vector<8x1xf32>
      tpu.vector_store %arg3[%c0_112, %c5], %246 {strides = array<i32>} : memref<8x10xf32, #tpu.memory_space<vmem>>, vector<8x1xf32>,
      %276 = vector.broadcast %272 : vector<8x1xi32> to vector<8x128xi32>
      %277 = arith.cmpi eq, %122, %276 : vector<8x128xi32>
      %278 = vector.broadcast %cst_64 : f32 to vector<8x128xf32>
      %279 = arith.select %277, %278, %224 : vector<8x128xi1>, vector<8x128xf32>
      %280 = vector.broadcast %272 : vector<8x1xi32> to vector<8x128xi32>
      %281 = arith.cmpi eq, %124, %280 : vector<8x128xi32>
      %282 = vector.broadcast %cst_64 : f32 to vector<8x128xf32>
      %283 = arith.select %281, %282, %228 : vector<8x128xi1>, vector<8x128xf32>
      %284 = vector.broadcast %272 : vector<8x1xi32> to vector<8x128xi32>
      %285 = arith.cmpi eq, %126, %284 : vector<8x128xi32>
      %286 = vector.broadcast %cst_64 : f32 to vector<8x128xf32>
      %287 = arith.select %285, %286, %232 : vector<8x128xi1>, vector<8x128xf32>
      %288 = vector.broadcast %272 : vector<8x1xi32> to vector<8x128xi32>
      %289 = arith.cmpi eq, %128, %288 : vector<8x128xi32>
      %290 = vector.broadcast %cst_64 : f32 to vector<8x128xf32>
      %291 = arith.select %289, %290, %236 : vector<8x128xi1>, vector<8x128xf32>
      %292 = vector.broadcast %272 : vector<8x1xi32> to vector<8x128xi32>
      %293 = arith.cmpi eq, %130, %292 : vector<8x128xi32>
      %294 = vector.broadcast %cst_64 : f32 to vector<8x128xf32>
      %295 = arith.select %293, %294, %240 : vector<8x128xi1>, vector<8x128xf32>
      %296 = arith.maximumf %279, %283 : vector<8x128xf32>
      %297 = arith.maximumf %296, %287 : vector<8x128xf32>
      %298 = arith.maximumf %297, %291 : vector<8x128xf32>
      %299 = arith.maximumf %298, %295 : vector<8x128xf32>
      %cst_113 = arith.constant dense<0xFF800000> : vector<8xf32>
      %300 = vector.multi_reduction <maximumf>, %299, %cst_113 [1] : vector<8x128xf32> to vector<8xf32>
      %301 = vector.shape_cast %300 : vector<8xf32> to vector<8x1xf32>
      %302 = vector.broadcast %301 : vector<8x1xf32> to vector<8x128xf32>
      %303 = arith.cmpf oeq, %279, %302 : vector<8x128xf32>
      %304 = vector.broadcast %c2147483647_i32_63 : i32 to vector<8x128xi32>
      %305 = arith.select %303, %122, %304 : vector<8x128xi1>, vector<8x128xi32>
      %306 = vector.broadcast %301 : vector<8x1xf32> to vector<8x128xf32>
      %307 = arith.cmpf oeq, %283, %306 : vector<8x128xf32>
      %308 = vector.broadcast %c2147483647_i32_63 : i32 to vector<8x128xi32>
      %309 = arith.select %307, %124, %308 : vector<8x128xi1>, vector<8x128xi32>
      %310 = arith.minsi %305, %309 : vector<8x128xi32>
      %311 = vector.broadcast %301 : vector<8x1xf32> to vector<8x128xf32>
      %312 = arith.cmpf oeq, %287, %311 : vector<8x128xf32>
      %313 = vector.broadcast %c2147483647_i32_63 : i32 to vector<8x128xi32>
      %314 = arith.select %312, %126, %313 : vector<8x128xi1>, vector<8x128xi32>
      %315 = arith.minsi %310, %314 : vector<8x128xi32>
      %316 = vector.broadcast %301 : vector<8x1xf32> to vector<8x128xf32>
      %317 = arith.cmpf oeq, %291, %316 : vector<8x128xf32>
      %318 = vector.broadcast %c2147483647_i32_63 : i32 to vector<8x128xi32>
      %319 = arith.select %317, %128, %318 : vector<8x128xi1>, vector<8x128xi32>
      %320 = arith.minsi %315, %319 : vector<8x128xi32>
      %321 = vector.broadcast %301 : vector<8x1xf32> to vector<8x128xf32>
      %322 = arith.cmpf oeq, %295, %321 : vector<8x128xf32>
      %323 = vector.broadcast %c2147483647_i32_63 : i32 to vector<8x128xi32>
      %324 = arith.select %322, %130, %323 : vector<8x128xi1>, vector<8x128xi32>
      %325 = arith.minsi %320, %324 : vector<8x128xi32>
      %cst_114 = arith.constant dense<2147483647> : vector<8xi32>
      %326 = vector.multi_reduction <minsi>, %325, %cst_114 [1] : vector<8x128xi32> to vector<8xi32>
      %327 = vector.shape_cast %326 : vector<8xi32> to vector<8x1xi32>
      %328 = arith.sitofp %327 : vector<8x1xi32> to vector<8x1xf32>
      %c0_115 = arith.constant 0 : index
      %c6 = arith.constant 6 : index
      %329 = vector.load %arg3[%c0_115, %c6] : memref<8x10xf32, #tpu.memory_space<vmem>>, vector<8x1xf32>
      tpu.vector_store %arg3[%c0_115, %c6], %328 {strides = array<i32>} : memref<8x10xf32, #tpu.memory_space<vmem>>, vector<8x1xf32>,
      %c0_116 = arith.constant 0 : index
      %c7 = arith.constant 7 : index
      %330 = vector.load %arg3[%c0_116, %c7] : memref<8x10xf32, #tpu.memory_space<vmem>>, vector<8x1xf32>
      tpu.vector_store %arg3[%c0_116, %c7], %301 {strides = array<i32>} : memref<8x10xf32, #tpu.memory_space<vmem>>, vector<8x1xf32>,
      %331 = vector.broadcast %327 : vector<8x1xi32> to vector<8x128xi32>
      %332 = arith.cmpi eq, %122, %331 : vector<8x128xi32>
      %333 = vector.broadcast %cst_64 : f32 to vector<8x128xf32>
      %334 = arith.select %332, %333, %279 : vector<8x128xi1>, vector<8x128xf32>
      %335 = vector.broadcast %327 : vector<8x1xi32> to vector<8x128xi32>
      %336 = arith.cmpi eq, %124, %335 : vector<8x128xi32>
      %337 = vector.broadcast %cst_64 : f32 to vector<8x128xf32>
      %338 = arith.select %336, %337, %283 : vector<8x128xi1>, vector<8x128xf32>
      %339 = vector.broadcast %327 : vector<8x1xi32> to vector<8x128xi32>
      %340 = arith.cmpi eq, %126, %339 : vector<8x128xi32>
      %341 = vector.broadcast %cst_64 : f32 to vector<8x128xf32>
      %342 = arith.select %340, %341, %287 : vector<8x128xi1>, vector<8x128xf32>
      %343 = vector.broadcast %327 : vector<8x1xi32> to vector<8x128xi32>
      %344 = arith.cmpi eq, %128, %343 : vector<8x128xi32>
      %345 = vector.broadcast %cst_64 : f32 to vector<8x128xf32>
      %346 = arith.select %344, %345, %291 : vector<8x128xi1>, vector<8x128xf32>
      %347 = vector.broadcast %327 : vector<8x1xi32> to vector<8x128xi32>
      %348 = arith.cmpi eq, %130, %347 : vector<8x128xi32>
      %349 = vector.broadcast %cst_64 : f32 to vector<8x128xf32>
      %350 = arith.select %348, %349, %295 : vector<8x128xi1>, vector<8x128xf32>
      %351 = arith.maximumf %334, %338 : vector<8x128xf32>
      %352 = arith.maximumf %351, %342 : vector<8x128xf32>
      %353 = arith.maximumf %352, %346 : vector<8x128xf32>
      %354 = arith.maximumf %353, %350 : vector<8x128xf32>
      %cst_117 = arith.constant dense<0xFF800000> : vector<8xf32>
      %355 = vector.multi_reduction <maximumf>, %354, %cst_117 [1] : vector<8x128xf32> to vector<8xf32>
      %356 = vector.shape_cast %355 : vector<8xf32> to vector<8x1xf32>
      %357 = vector.broadcast %356 : vector<8x1xf32> to vector<8x128xf32>
      %358 = arith.cmpf oeq, %334, %357 : vector<8x128xf32>
      %359 = vector.broadcast %c2147483647_i32_63 : i32 to vector<8x128xi32>
      %360 = arith.select %358, %122, %359 : vector<8x128xi1>, vector<8x128xi32>
      %361 = vector.broadcast %356 : vector<8x1xf32> to vector<8x128xf32>
      %362 = arith.cmpf oeq, %338, %361 : vector<8x128xf32>
      %363 = vector.broadcast %c2147483647_i32_63 : i32 to vector<8x128xi32>
      %364 = arith.select %362, %124, %363 : vector<8x128xi1>, vector<8x128xi32>
      %365 = arith.minsi %360, %364 : vector<8x128xi32>
      %366 = vector.broadcast %356 : vector<8x1xf32> to vector<8x128xf32>
      %367 = arith.cmpf oeq, %342, %366 : vector<8x128xf32>
      %368 = vector.broadcast %c2147483647_i32_63 : i32 to vector<8x128xi32>
      %369 = arith.select %367, %126, %368 : vector<8x128xi1>, vector<8x128xi32>
      %370 = arith.minsi %365, %369 : vector<8x128xi32>
      %371 = vector.broadcast %356 : vector<8x1xf32> to vector<8x128xf32>
      %372 = arith.cmpf oeq, %346, %371 : vector<8x128xf32>
      %373 = vector.broadcast %c2147483647_i32_63 : i32 to vector<8x128xi32>
      %374 = arith.select %372, %128, %373 : vector<8x128xi1>, vector<8x128xi32>
      %375 = arith.minsi %370, %374 : vector<8x128xi32>
      %376 = vector.broadcast %356 : vector<8x1xf32> to vector<8x128xf32>
      %377 = arith.cmpf oeq, %350, %376 : vector<8x128xf32>
      %378 = vector.broadcast %c2147483647_i32_63 : i32 to vector<8x128xi32>
      %379 = arith.select %377, %130, %378 : vector<8x128xi1>, vector<8x128xi32>
      %380 = arith.minsi %375, %379 : vector<8x128xi32>
      %cst_118 = arith.constant dense<2147483647> : vector<8xi32>
      %381 = vector.multi_reduction <minsi>, %380, %cst_118 [1] : vector<8x128xi32> to vector<8xi32>
      %382 = vector.shape_cast %381 : vector<8xi32> to vector<8x1xi32>
      %383 = arith.sitofp %382 : vector<8x1xi32> to vector<8x1xf32>
      %c0_119 = arith.constant 0 : index
      %c8 = arith.constant 8 : index
      %384 = vector.load %arg3[%c0_119, %c8] : memref<8x10xf32, #tpu.memory_space<vmem>>, vector<8x1xf32>
      tpu.vector_store %arg3[%c0_119, %c8], %383 {strides = array<i32>} : memref<8x10xf32, #tpu.memory_space<vmem>>, vector<8x1xf32>,
      %c0_120 = arith.constant 0 : index
      %c9 = arith.constant 9 : index
      %385 = vector.load %arg3[%c0_120, %c9] : memref<8x10xf32, #tpu.memory_space<vmem>>, vector<8x1xf32>
      tpu.vector_store %arg3[%c0_120, %c9], %356 {strides = array<i32>} : memref<8x10xf32, #tpu.memory_space<vmem>>, vector<8x1xf32>,
    } else {
    }
    return
  }
  func.func @transform_0(%arg0: i32, %arg1: i32) -> (i32, i32) {
    %c0_i32 = arith.constant 0 : i32
    return %arg0, %arg1 : i32, i32
  }
  func.func @transform_1(%arg0: i32, %arg1: i32) -> (i32, i32) {
    %c0_i32 = arith.constant 0 : i32
    %c0_i32_0 = arith.constant 0 : i32
    return %arg0, %c0_i32 : i32, i32
  }
}

</mosaic_0001>

<bundles_post_ra>
// kernel: tpu_custom_call.1
= control target key start
LH: loop header
LB: loop body
LE: loop exit
PB: predicated region body
PF: predicated region fallthrough
CT: control target
= control target key end

     0   :  { %6 = vsyncpa [#allocation5], 0  ;;  %s532_s0 = inlined_call_operand.hbm [shape: f32[8,128], index: 0, kind: input, shape index: {}]   ;;  %s533_s1 = inlined_call_operand.hbm [shape: f32[8,10], index: 1, kind: output, shape index: {}]  }
   0x1   :  { %7 = vsyncpa [#allocation6], 0  ;;  %s444_s6 = smov [#allocation4]  }
   0x2   :  { %s14_s7 = sshll.u32 %s444_s6, 4  ;;  %s15_s7 = int_to_ptr.vmem [resolvable:$true] %s14_s7 }
   0x3   :  { %s408_s8 = scalar_lea.vmem %s15_s7, 128  ;;  %p413_p1 = scmp.lt.s32.totalorder %s15_s7, %s15_s7 }
   0x4   :  { %p409_p0 = scmp.ne.s32.totalorder %s15_s7, %s408_s8  ;;  %p414_p2 = scmp.lt.s32.totalorder %s408_s8, %s408_s8 }
   0x6   :  { %p415_p3 = por %p414_p2, %p413_p1 }
   0x8   :  { %p416_p4 = pnand %p415_p3, %p409_p0 }
   0xa   :  { %419 = shalt.err (!%p416_p4)
}
   0xb   :  { %17 = dma.hbm_to_vmem [thread:$0]  %s532_s0, 128, %s15_s7, [#allocation5]  }
   0xc   :  { %440 = dma.done.wait [#allocation5], 128  }
   0xd   :  { %441 = vsyncadd [#allocation5], 4294967168  ;;  %v35_v0 = vlaneseq  ;;  %v41_v2 = vld [vmem:[#allocation4] sm:$0xff]  ;;  %s445_s0 = smov [#allocation7]  }
   0xe   :  { %vm46_vm0 = vcmp.gt.f32.partialorder %v41_v2, -inf  ;;  %vm47_vm1 = vcmp.eq.f32.partialorder %v41_v2, -inf  ;;  %s389_s11 = sshll.u32 %s445_s0, 4  ;;  %s390_s11 = int_to_ptr.vmem [resolvable:$true] %s389_s11 }
   0xf   :  { %v36_v1 = vand.u32 127, %v35_v0  ;;  %vm50_vm2 = vmor %vm46_vm0, %vm47_vm1  ;;  %s420_s12 = scalar_lea.vmem %s390_s11, 128  ;;  %p425_p6 = scmp.lt.s32.totalorder %s390_s11, %s390_s11 }
  0x10   :  { %v55_v4 = vsel %vm50_vm2, -inf, %v41_v2  ;;  %v461_v6 = vsel %vm50_vm2, %v41_v2, -inf  ;;  %p421_p5 = scmp.ne.s32.totalorder %s390_s11, %s420_s12  ;;  %p426_p7 = scmp.lt.s32.totalorder %s420_s12, %s420_s12 }
  0x11   :  { %v459_v3 = vsel %vm50_vm2, %v36_v1, 2147483647  ;;  %v56_v5 = vsel %vm50_vm2, 2147483647, %v36_v1  ;;  %vm61_vm3 = vcmp.gt.f32.partialorder %v55_v4, -inf  ;;  %vm62_vm4 = vcmp.eq.f32.partialorder %v55_v4, -inf }
  0x12   :  { %vm63_vm5 = vcmp.lt.s32.totalorder %v56_v5, 2147483647  ;;  %p427_p8 = por %p426_p7, %p425_p6 }
  0x13   :  { %vm64_vm6 = vmand %vm62_vm4, %vm63_vm5 }
  0x14   :  { %vm65_vm7 = vmor %vm61_vm3, %vm64_vm6  ;;  %p428_p9 = pnand %p427_p8, %p421_p5 }
  0x15   :  { %v463_v7 = vsel %vm65_vm7, %v55_v4, -inf  ;;  %v465_v8 = vsel %vm65_vm7, %v56_v5, 2147483647  ;;  %v70_v9 = vsel %vm65_vm7, -inf, %v55_v4  ;;  %v71_v10 = vsel %vm65_vm7, 2147483647, %v56_v5 }
  0x16   :  { %vm76_vm8 = vcmp.gt.f32.partialorder %v70_v9, -inf  ;;  %vm77_vm9 = vcmp.eq.f32.partialorder %v70_v9, -inf  ;;  %vm78_vm10 = vcmp.lt.s32.totalorder %v71_v10, 2147483647  ;;  %v128_v11 = vmax.f32 %v461_v6, %v463_v7 }
  0x17   :  { %vm79_vm11 = vmand %vm77_vm9, %vm78_vm10 }
  0x18   :  { %vm80_vm12 = vmor %vm76_vm8, %vm79_vm11 }
  0x19   :  { %v469_v12 = vsel %vm80_vm12, %v70_v9, -inf  ;;  %v471_v13 = vsel %vm80_vm12, %v71_v10, 2147483647  ;;  %v85_v14 = vsel %vm80_vm12, -inf, %v70_v9  ;;  %v86_v15 = vsel %vm80_vm12, 2147483647, %v71_v10 }
  0x1a   :  { %vm91_vm13 = vcmp.gt.f32.partialorder %v85_v14, -inf  ;;  %vm92_vm14 = vcmp.eq.f32.partialorder %v85_v14, -inf  ;;  %vm93_vm15 = vcmp.lt.s32.totalorder %v86_v15, 2147483647  ;;  %v129_v16 = vmax.f32 %v128_v11, %v469_v12 }
  0x1b   :  { %vm94_vm0 = vmand %vm92_vm14, %vm93_vm15 }
  0x1c   :  { %vm95_vm1 = vmor %vm91_vm13, %vm94_vm0 }
  0x1d   :  { %v96_v17 = vsel %vm95_vm1, %v85_v14, -inf  ;;  %v474_v18 = vsel %vm95_vm1, %v86_v15, 2147483647  ;;  %v100_v19 = vsel %vm95_vm1, -inf, %v85_v14  ;;  %v101_v20 = vsel %vm95_vm1, 2147483647, %v86_v15 }
  0x1e   :  { %vm106_vm2 = vcmp.gt.f32.partialorder %v100_v19, -inf  ;;  %vm107_vm3 = vcmp.eq.f32.partialorder %v100_v19, -inf  ;;  %vm108_vm4 = vcmp.lt.s32.totalorder %v101_v20, 2147483647  ;;  %v130_v21 = vmax.f32 %v129_v16, %v96_v17 }
  0x1f   :  { %vm109_vm5 = vmand %vm107_vm3, %vm108_vm4  ;;  %vm167_vm1 = vcmask 7168  }
  0x20   :  { %vm110_vm6 = vmor %vm106_vm2, %vm109_vm5  ;;  %vm169_vm2 = vcmask 15368  }
  0x21   :  { %v111_v22 = vsel %vm110_vm6, %v100_v19, -inf  ;;  %v476_v23 = vsel %vm110_vm6, %v101_v20, 2147483647 }
  0x22   :  { %v131_v24 = vmax.f32 %v130_v21, %v111_v22 }
  0x24   :  { %132 = vmax.xlane.f32.xlu0 %v131_v24 }
  0xad   :  { %v133_v25 = vpop.xlane.xlu0 %132 }
  0xae   :  { %vm134_vm7 = vcmp.eq.f32.partialorder %v461_v6, %v133_v25  ;;  %vm136_vm8 = vcmp.eq.f32.partialorder %v463_v7, %v133_v25  ;;  %vm140_vm9 = vcmp.eq.f32.partialorder %v469_v12, %v133_v25  ;;  %vm144_vm11 = vcmp.eq.f32.partialorder %v96_v17, %v133_v25 }
  0xaf   :  { %v135_v26 = vsel %vm134_vm7, %v459_v3, 2147483647  ;;  %v137_v27 = vsel %vm136_vm8, %v465_v8, 2147483647  ;;  %v141_v29 = vsel %vm140_vm9, %v471_v13, 2147483647  ;;  %vm148_vm13 = vcmp.eq.f32.partialorder %v111_v22, %v133_v25 }
  0xb0   :  { %vm138_vm10 = vcmp.lt.s32.totalorder %v135_v26, %v137_v27  ;;  %v145_v31 = vsel %vm144_vm11, %v474_v18, 2147483647  ;;  %v149_v33 = vsel %vm148_vm13, %v476_v23, 2147483647 }
  0xb1   :  { %v139_v28 = vsel %vm138_vm10, %v135_v26, %v137_v27 }
  0xb2   :  { %vm142_vm12 = vcmp.lt.s32.totalorder %v139_v28, %v141_v29 }
  0xb3   :  { %v143_v30 = vsel %vm142_vm12, %v139_v28, %v141_v29 }
  0xb4   :  { %vm146_vm14 = vcmp.lt.s32.totalorder %v143_v30, %v145_v31 }
  0xb5   :  { %v147_v32 = vsel %vm146_vm14, %v143_v30, %v145_v31 }
  0xb6   :  { %vm150_vm15 = vcmp.lt.s32.totalorder %v147_v32, %v149_v33 }
  0xb7   :  { %v151_v34 = vsel %vm150_vm15, %v147_v32, %v149_v33 }
  0xb8   :  { %v153_v35 = vshra.s32 %v151_v34, 16  ;;  %v152_v37 = vand.u32 65535, %v151_v34 }
  0xba   :  { %v155_v36 = vcvt.s32.f32 %v153_v35  ;;  %v154_v39 = vcvt.s32.f32 %v152_v37 }
  0xbc   :  { %156 = vmin.xlane.f32.xlu0 %v155_v36 }
 0x145   :  { %v157_v38 = vpop.xlane.xlu0 %156 }
 0x146   :  { %vm158_vm0 = vcmp.eq.f32.partialorder %v155_v36, %v157_v38  ;;  %v163_v41 = vcvt.f32.s32 %v157_v38 }
 0x147   :  { %v159_v40 = vsel %vm158_vm0, %v154_v39, inf }
 0x148   :  { %160 = vmin.xlane.f32.xlu1 %v159_v40  ;;  %v164_v43 = vshll.u32 %v163_v41, 16 }
 0x1d1   :  { %v161_v42 = vpop.xlane.xlu1 %160 }
 0x1d2   :  { %v162_v44 = vcvt.f32.s32 %v161_v42 }
 0x1d4   :  { %v165_v45 = vadd.s32 %v164_v43, %v162_v44 }
 0x1d6   :  { %v166_v46 = vcvt.s32.f32 %v165_v45  ;;  %vm171_vm3 = vcmp.eq.s32.totalorder %v459_v3, %v165_v45  ;;  %vm173_vm4 = vcmp.eq.s32.totalorder %v465_v8, %v165_v45  ;;  %vm175_vm5 = vcmp.eq.s32.totalorder %v471_v13, %v165_v45 }
 0x1d7   :  { %v172_v47 = vsel %vm171_vm3, -inf, %v461_v6  ;;  %v174_v48 = vsel %vm173_vm4, -inf, %v463_v7  ;;  %vm177_vm6 = vcmp.eq.s32.totalorder %v474_v18, %v165_v45  ;;  %v176_v50 = vsel %vm175_vm5, -inf, %v469_v12 }
 0x1d8   :  { %168 = vst.msk [vmem:[#allocation7] sm:$0xff] %vm167_vm1, %v166_v46  ;;  %v181_v49 = vmax.f32 %v172_v47, %v174_v48  ;;  %vm179_vm7 = vcmp.eq.s32.totalorder %v476_v23, %v165_v45  ;;  %v178_v52 = vsel %vm177_vm6, -inf, %v96_v17  ;;  %vm222_vm3 = vcmask 31768  }
 0x1d9   :  { %170 = vst.msk [vmem:[#allocation7] sm:$0xff] %vm169_vm2, %v133_v25  ;;  %v180_v54 = vsel %vm179_vm7, -inf, %v111_v22  ;;  %vm220_vm2 = vcmask 23568  }
 0x1da   :  { %v182_v51 = vmax.f32 %v181_v49, %v176_v50 }
 0x1dc   :  { %v183_v53 = vmax.f32 %v182_v51, %v178_v52 }
 0x1de   :  { %v184_v55 = vmax.f32 %v183_v53, %v180_v54 }
 0x1e0   :  { %185 = vmax.xlane.f32.xlu1 %v184_v55 }
 0x269   :  { %v186_v56 = vpop.xlane.xlu1 %185 }
 0x26a   :  { %vm187_vm8 = vcmp.eq.f32.partialorder %v172_v47, %v186_v56  ;;  %vm189_vm9 = vcmp.eq.f32.partialorder %v174_v48, %v186_v56  ;;  %vm193_vm10 = vcmp.eq.f32.partialorder %v176_v50, %v186_v56  ;;  %vm197_vm12 = vcmp.eq.f32.partialorder %v178_v52, %v186_v56 }
 0x26b   :  { %v188_v57 = vsel %vm187_vm8, %v459_v3, 2147483647  ;;  %v190_v58 = vsel %vm189_vm9, %v465_v8, 2147483647  ;;  %v194_v60 = vsel %vm193_vm10, %v471_v13, 2147483647  ;;  %vm201_vm14 = vcmp.eq.f32.partialorder %v180_v54, %v186_v56 }
 0x26c   :  { %vm191_vm11 = vcmp.lt.s32.totalorder %v188_v57, %v190_v58  ;;  %v198_v62 = vsel %vm197_vm12, %v474_v18, 2147483647  ;;  %v202_v0 = vsel %vm201_vm14, %v476_v23, 2147483647 }
 0x26d   :  { %v192_v59 = vsel %vm191_vm11, %v188_v57, %v190_v58 }
 0x26e   :  { %vm195_vm13 = vcmp.lt.s32.totalorder %v192_v59, %v194_v60 }
 0x26f   :  { %v196_v61 = vsel %vm195_vm13, %v192_v59, %v194_v60 }
 0x270   :  { %vm199_vm15 = vcmp.lt.s32.totalorder %v196_v61, %v198_v62 }
 0x271   :  { %v200_v63 = vsel %vm199_vm15, %v196_v61, %v198_v62 }
 0x272   :  { %vm203_vm0 = vcmp.lt.s32.totalorder %v200_v63, %v202_v0 }
 0x273   :  { %v204_v1 = vsel %vm203_vm0, %v200_v63, %v202_v0 }
 0x274   :  { %v206_v2 = vshra.s32 %v204_v1, 16  ;;  %v205_v5 = vand.u32 65535, %v204_v1 }
 0x276   :  { %v208_v4 = vcvt.s32.f32 %v206_v2  ;;  %v207_v7 = vcvt.s32.f32 %v205_v5 }
 0x278   :  { %209 = vmin.xlane.f32.xlu0 %v208_v4 }
 0x301   :  { %v210_v6 = vpop.xlane.xlu0 %209 }
 0x302   :  { %vm211_vm1 = vcmp.eq.f32.partialorder %v208_v4, %v210_v6  ;;  %v216_v10 = vcvt.f32.s32 %v210_v6 }
 0x303   :  { %v212_v9 = vsel %vm211_vm1, %v207_v7, inf }
 0x304   :  { %213 = vmin.xlane.f32.xlu1 %v212_v9  ;;  %v217_v12 = vshll.u32 %v216_v10, 16 }
 0x38d   :  { %v214_v11 = vpop.xlane.xlu1 %213 }
 0x38e   :  { %v215_v14 = vcvt.f32.s32 %v214_v11 }
 0x390   :  { %v218_v15 = vadd.s32 %v217_v12, %v215_v14 }
 0x392   :  { %v219_v16 = vcvt.s32.f32 %v218_v15  ;;  %vm224_vm4 = vcmp.eq.s32.totalorder %v459_v3, %v218_v15  ;;  %vm226_vm5 = vcmp.eq.s32.totalorder %v465_v8, %v218_v15  ;;  %vm228_vm6 = vcmp.eq.s32.totalorder %v471_v13, %v218_v15 }
 0x393   :  { %v225_v17 = vsel %vm224_vm4, -inf, %v172_v47  ;;  %v227_v19 = vsel %vm226_vm5, -inf, %v174_v48  ;;  %vm230_vm7 = vcmp.eq.s32.totalorder %v474_v18, %v218_v15  ;;  %v229_v21 = vsel %vm228_vm6, -inf, %v176_v50 }
 0x394   :  { %221 = vst.msk [vmem:[#allocation7] sm:$0xff] %vm220_vm2, %v219_v16  ;;  %v234_v20 = vmax.f32 %v225_v17, %v227_v19  ;;  %vm232_vm8 = vcmp.eq.s32.totalorder %v476_v23, %v218_v15  ;;  %v231_v24 = vsel %vm230_vm7, -inf, %v178_v52  ;;  %vm275_vm4 = vcmask 48168  }
 0x395   :  { %223 = vst.msk [vmem:[#allocation7] sm:$0xff] %vm222_vm3, %v186_v56  ;;  %v233_v26 = vsel %vm232_vm8, -inf, %v180_v54  ;;  %vm273_vm3 = vcmask 39968  }
 0x396   :  { %v235_v22 = vmax.f32 %v234_v20, %v229_v21 }
 0x398   :  { %v236_v25 = vmax.f32 %v235_v22, %v231_v24 }
 0x39a   :  { %v237_v27 = vmax.f32 %v236_v25, %v233_v26 }
 0x39c   :  { %238 = vmax.xlane.f32.xlu0 %v237_v27 }
 0x425   :  { %v239_v28 = vpop.xlane.xlu0 %238 }
 0x426   :  { %vm240_vm9 = vcmp.eq.f32.partialorder %v225_v17, %v239_v28  ;;  %vm242_vm10 = vcmp.eq.f32.partialorder %v227_v19, %v239_v28  ;;  %vm246_vm11 = vcmp.eq.f32.partialorder %v229_v21, %v239_v28  ;;  %vm250_vm13 = vcmp.eq.f32.partialorder %v231_v24, %v239_v28 }
 0x427   :  { %v241_v29 = vsel %vm240_vm9, %v459_v3, 2147483647  ;;  %v243_v30 = vsel %vm242_vm10, %v465_v8, 2147483647  ;;  %v247_v32 = vsel %vm246_vm11, %v471_v13, 2147483647  ;;  %vm254_vm15 = vcmp.eq.f32.partialorder %v233_v26, %v239_v28 }
 0x428   :  { %vm244_vm12 = vcmp.lt.s32.totalorder %v241_v29, %v243_v30  ;;  %v251_v34 = vsel %vm250_vm13, %v474_v18, 2147483647  ;;  %v255_v36 = vsel %vm254_vm15, %v476_v23, 2147483647 }
 0x429   :  { %v245_v31 = vsel %vm244_vm12, %v241_v29, %v243_v30 }
 0x42a   :  { %vm248_vm14 = vcmp.lt.s32.totalorder %v245_v31, %v247_v32 }
 0x42b   :  { %v249_v33 = vsel %vm248_vm14, %v245_v31, %v247_v32 }
 0x42c   :  { %vm252_vm0 = vcmp.lt.s32.totalorder %v249_v33, %v251_v34 }
 0x42d   :  { %v253_v35 = vsel %vm252_vm0, %v249_v33, %v251_v34 }
 0x42e   :  { %vm256_vm1 = vcmp.lt.s32.totalorder %v253_v35, %v255_v36 }
 0x42f   :  { %v257_v37 = vsel %vm256_vm1, %v253_v35, %v255_v36 }
 0x430   :  { %v259_v38 = vshra.s32 %v257_v37, 16  ;;  %v258_v40 = vand.u32 65535, %v257_v37 }
 0x432   :  { %v261_v39 = vcvt.s32.f32 %v259_v38  ;;  %v260_v42 = vcvt.s32.f32 %v258_v40 }
 0x434   :  { %262 = vmin.xlane.f32.xlu1 %v261_v39 }
 0x4bd   :  { %v263_v41 = vpop.xlane.xlu1 %262 }
 0x4be   :  { %vm264_vm2 = vcmp.eq.f32.partialorder %v261_v39, %v263_v41  ;;  %v269_v44 = vcvt.f32.s32 %v263_v41 }
 0x4bf   :  { %v265_v43 = vsel %vm264_vm2, %v260_v42, inf }
 0x4c0   :  { %266 = vmin.xlane.f32.xlu0 %v265_v43  ;;  %v270_v46 = vshll.u32 %v269_v44, 16 }
 0x549   :  { %v267_v45 = vpop.xlane.xlu0 %266 }
 0x54a   :  { %v268_v47 = vcvt.f32.s32 %v267_v45 }
 0x54c   :  { %v271_v48 = vadd.s32 %v270_v46, %v268_v47 }
 0x54e   :  { %v272_v49 = vcvt.s32.f32 %v271_v48  ;;  %vm277_vm5 = vcmp.eq.s32.totalorder %v459_v3, %v271_v48  ;;  %vm279_vm6 = vcmp.eq.s32.totalorder %v465_v8, %v271_v48  ;;  %vm281_vm7 = vcmp.eq.s32.totalorder %v471_v13, %v271_v48 }
 0x54f   :  { %v278_v50 = vsel %vm277_vm5, -inf, %v225_v17  ;;  %v280_v51 = vsel %vm279_vm6, -inf, %v227_v19  ;;  %vm283_vm8 = vcmp.eq.s32.totalorder %v474_v18, %v271_v48  ;;  %v282_v53 = vsel %vm281_vm7, -inf, %v229_v21 }
 0x550   :  { %v287_v52 = vmax.f32 %v278_v50, %v280_v51  ;;  %274 = vst.msk [vmem:[#allocation7] sm:$0xff] %vm273_vm3, %v272_v49  ;;  %vm285_vm9 = vcmp.eq.s32.totalorder %v476_v23, %v271_v48  ;;  %v284_v55 = vsel %vm283_vm8, -inf, %v231_v24  ;;  %vm328_vm5 = vcmask 64568  }
 0x551   :  { %276 = vst.msk [vmem:[#allocation7] sm:$0xff] %vm275_vm4, %v239_v28  ;;  %v286_v57 = vsel %vm285_vm9, -inf, %v233_v26  ;;  %vm326_vm4 = vcmask 56368  }
 0x552   :  { %v288_v54 = vmax.f32 %v287_v52, %v282_v53 }
 0x554   :  { %v289_v56 = vmax.f32 %v288_v54, %v284_v55 }
 0x556   :  { %v290_v58 = vmax.f32 %v289_v56, %v286_v57 }
 0x558   :  { %291 = vmax.xlane.f32.xlu1 %v290_v58 }
 0x5e1   :  { %v292_v59 = vpop.xlane.xlu1 %291 }
 0x5e2   :  { %vm293_vm10 = vcmp.eq.f32.partialorder %v278_v50, %v292_v59  ;;  %vm295_vm11 = vcmp.eq.f32.partialorder %v280_v51, %v292_v59  ;;  %vm299_vm12 = vcmp.eq.f32.partialorder %v282_v53, %v292_v59  ;;  %vm303_vm14 = vcmp.eq.f32.partialorder %v284_v55, %v292_v59 }
 0x5e3   :  { %v294_v60 = vsel %vm293_vm10, %v459_v3, 2147483647  ;;  %v296_v61 = vsel %vm295_vm11, %v465_v8, 2147483647  ;;  %v300_v63 = vsel %vm299_vm12, %v471_v13, 2147483647  ;;  %vm307_vm0 = vcmp.eq.f32.partialorder %v286_v57, %v292_v59 }
 0x5e4   :  { %vm297_vm13 = vcmp.lt.s32.totalorder %v294_v60, %v296_v61  ;;  %v304_v1 = vsel %vm303_vm14, %v474_v18, 2147483647  ;;  %v308_v4 = vsel %vm307_vm0, %v476_v23, 2147483647 }
 0x5e5   :  { %v298_v62 = vsel %vm297_vm13, %v294_v60, %v296_v61 }
 0x5e6   :  { %vm301_vm15 = vcmp.lt.s32.totalorder %v298_v62, %v300_v63 }
 0x5e7   :  { %v302_v0 = vsel %vm301_vm15, %v298_v62, %v300_v63 }
 0x5e8   :  { %vm305_vm1 = vcmp.lt.s32.totalorder %v302_v0, %v304_v1 }
 0x5e9   :  { %v306_v2 = vsel %vm305_vm1, %v302_v0, %v304_v1 }
 0x5ea   :  { %vm309_vm2 = vcmp.lt.s32.totalorder %v306_v2, %v308_v4 }
 0x5eb   :  { %v310_v5 = vsel %vm309_vm2, %v306_v2, %v308_v4 }
 0x5ec   :  { %v312_v6 = vshra.s32 %v310_v5, 16  ;;  %v311_v9 = vand.u32 65535, %v310_v5 }
 0x5ee   :  { %v314_v7 = vcvt.s32.f32 %v312_v6  ;;  %v313_v11 = vcvt.s32.f32 %v311_v9 }
 0x5f0   :  { %315 = vmin.xlane.f32.xlu0 %v314_v7 }
 0x679   :  { %v316_v10 = vpop.xlane.xlu0 %315 }
 0x67a   :  { %vm317_vm3 = vcmp.eq.f32.partialorder %v314_v7, %v316_v10  ;;  %v322_v14 = vcvt.f32.s32 %v316_v10 }
 0x67b   :  { %v318_v12 = vsel %vm317_vm3, %v313_v11, inf }
 0x67c   :  { %319 = vmin.xlane.f32.xlu1 %v318_v12  ;;  %v323_v16 = vshll.u32 %v322_v14, 16 }
 0x705   :  { %v320_v15 = vpop.xlane.xlu1 %319 }
 0x706   :  { %v321_v17 = vcvt.f32.s32 %v320_v15 }
 0x708   :  { %v324_v19 = vadd.s32 %v323_v16, %v321_v17 }
 0x70a   :  { %v325_v20 = vcvt.s32.f32 %v324_v19  ;;  %vm330_vm6 = vcmp.eq.s32.totalorder %v459_v3, %v324_v19  ;;  %vm332_vm7 = vcmp.eq.s32.totalorder %v465_v8, %v324_v19  ;;  %vm334_vm8 = vcmp.eq.s32.totalorder %v471_v13, %v324_v19 }
 0x70b   :  { %v331_v21 = vsel %vm330_vm6, -inf, %v278_v50  ;;  %v333_v22 = vsel %vm332_vm7, -inf, %v280_v51  ;;  %vm336_vm9 = vcmp.eq.s32.totalorder %v474_v18, %v324_v19  ;;  %v335_v25 = vsel %vm334_vm8, -inf, %v282_v53 }
 0x70c   :  { %v340_v24 = vmax.f32 %v331_v21, %v333_v22  ;;  %327 = vst.msk [vmem:[#allocation7] sm:$0xff] %vm326_vm4, %v325_v20  ;;  %vm338_vm10 = vcmp.eq.s32.totalorder %v476_v23, %v324_v19  ;;  %v337_v27 = vsel %vm336_vm9, -inf, %v284_v55  ;;  %vm381_vm6 = vcmask 80968  }
 0x70d   :  { %329 = vst.msk [vmem:[#allocation7] sm:$0xff] %vm328_vm5, %v292_v59  ;;  %v339_v29 = vsel %vm338_vm10, -inf, %v286_v57  ;;  %vm379_vm5 = vcmask 72768  }
 0x70e   :  { %v341_v26 = vmax.f32 %v340_v24, %v335_v25 }
 0x710   :  { %v342_v28 = vmax.f32 %v341_v26, %v337_v27 }
 0x712   :  { %v343_v30 = vmax.f32 %v342_v28, %v339_v29 }
 0x714   :  { %344 = vmax.xlane.f32.xlu0 %v343_v30 }
 0x79d   :  { %v345_v31 = vpop.xlane.xlu0 %344 }
 0x79e   :  { %vm346_vm11 = vcmp.eq.f32.partialorder %v331_v21, %v345_v31  ;;  %vm348_vm12 = vcmp.eq.f32.partialorder %v333_v22, %v345_v31  ;;  %vm352_vm13 = vcmp.eq.f32.partialorder %v335_v25, %v345_v31  ;;  %vm356_vm15 = vcmp.eq.f32.partialorder %v337_v27, %v345_v31 }
 0x79f   :  { %v347_v32 = vsel %vm346_vm11, %v459_v3, 2147483647  ;;  %v349_v33 = vsel %vm348_vm12, %v465_v8, 2147483647  ;;  %v353_v35 = vsel %vm352_vm13, %v471_v13, 2147483647  ;;  %vm360_vm1 = vcmp.eq.f32.partialorder %v339_v29, %v345_v31 }
 0x7a0   :  { %vm350_vm14 = vcmp.lt.s32.totalorder %v347_v32, %v349_v33  ;;  %v357_v37 = vsel %vm356_vm15, %v474_v18, 2147483647  ;;  %v361_v39 = vsel %vm360_vm1, %v476_v23, 2147483647 }
 0x7a1   :  { %v351_v34 = vsel %vm350_vm14, %v347_v32, %v349_v33 }
 0x7a2   :  { %vm354_vm0 = vcmp.lt.s32.totalorder %v351_v34, %v353_v35 }
 0x7a3   :  { %v355_v36 = vsel %vm354_vm0, %v351_v34, %v353_v35 }
 0x7a4   :  { %vm358_vm2 = vcmp.lt.s32.totalorder %v355_v36, %v357_v37 }
 0x7a5   :  { %v359_v38 = vsel %vm358_vm2, %v355_v36, %v357_v37 }
 0x7a6   :  { %vm362_vm3 = vcmp.lt.s32.totalorder %v359_v38, %v361_v39 }
 0x7a7   :  { %v363_v40 = vsel %vm362_vm3, %v359_v38, %v361_v39 }
 0x7a8   :  { %v365_v41 = vshra.s32 %v363_v40, 16  ;;  %v364_v8 = vand.u32 65535, %v363_v40 }
 0x7aa   :  { %v367_v3 = vcvt.s32.f32 %v365_v41  ;;  %v366_v43 = vcvt.s32.f32 %v364_v8 }
 0x7ac   :  { %368 = vmin.xlane.f32.xlu1 %v367_v3 }
 0x835   :  { %v369_v42 = vpop.xlane.xlu1 %368 }
 0x836   :  { %vm370_vm4 = vcmp.eq.f32.partialorder %v367_v3, %v369_v42  ;;  %v375_v13 = vcvt.f32.s32 %v369_v42 }
 0x837   :  { %v371_v44 = vsel %vm370_vm4, %v366_v43, inf }
 0x838   :  { %372 = vmin.xlane.f32.xlu0 %v371_v44  ;;  %v376_v46 = vshll.u32 %v375_v13, 16 }
 0x8c1   :  { %v373_v45 = vpop.xlane.xlu0 %372 }
 0x8c2   :  { %v374_v47 = vcvt.f32.s32 %v373_v45 }
 0x8c4   :  { %v377_v18 = vadd.s32 %v376_v46, %v374_v47 }
 0x8c6   :  { %v378_v23 = vcvt.s32.f32 %v377_v18 }
 0x8c8   :  { %380 = vst.msk [vmem:[#allocation7] sm:$0xff] %vm379_vm5, %v378_v23 }
 0x8c9   :  { %382 = vst.msk [vmem:[#allocation7] sm:$0xff] %vm381_vm6, %v345_v31 }
 0x8ca   :  { %431 = shalt.err (!%p428_p9)
}
 0x8cb   :  { %392 = dma.vmem_to_hbm [thread:$0]  %s390_s11, 128, %s533_s1, [#allocation6]  }
 0x8cc   :  { %442 = dma.done.wait [#allocation6], 128  }
 0x8cd   :  { %443 = vsyncadd [#allocation6], 4294967168 }
 0x8ce   :  { %396 = vsyncpa [#allocation5], 1 }
 0x8cf   :  { %397 = vsyncpa [#allocation6], 1 }

</bundles_post_ra>
